<compile_context>
chip_gen: v7x
topology: tpu7x:2x2x1
jax: 0.10.0
libtpu: 0.0.40
codegen_flags: <defaults>
</compile_context>

<pallas_src>
import jax
import jax.numpy as jnp
from jax.experimental import pallas as pl
from jax.experimental.pallas import tpu as pltpu


def _round_up(n, m):
    return ((n + m - 1) // m) * m


# ----------------------------- Pallas kernels --------------------------------

def _resnet_kernel_linear(x_ref, w0_ref, b0_ref, w1_ref, ws_ref, b1_ref, o_ref):
    """One (tm, size_in) batch tile; linear shortcut (size_in != size_out)."""
    x = x_ref[...].astype(jnp.float32)                       # (tm, size_in) f32
    h = jnp.maximum(x, 0.0)                                   # relu(x)       (VPU, f32)
    net = jnp.dot(h.astype(w0_ref.dtype), w0_ref[...],
                  preferred_element_type=jnp.float32)         # fc_0 -> (tm, h_p)
    net = jnp.maximum(net + b0_ref[...], 0.0)                 # relu(fc_0)    (VPU, f32)
    out = jnp.dot(net.astype(w1_ref.dtype), w1_ref[...],
                  preferred_element_type=jnp.float32)         # fc_1
    out += jnp.dot(x.astype(ws_ref.dtype), ws_ref[...],
                   preferred_element_type=jnp.float32)        # shortcut(x)
    out += b1_ref[...]
    o_ref[...] = out.astype(o_ref.dtype)


def _resnet_kernel_identity(x_ref, w0_ref, b0_ref, w1_ref, b1_ref, o_ref):
    """One (tm, size_in) batch tile; identity shortcut (size_in == size_out)."""
    x = x_ref[...].astype(jnp.float32)                        # (tm, size_in) f32
    h = jnp.maximum(x, 0.0)
    net = jnp.dot(h.astype(w0_ref.dtype), w0_ref[...],
                  preferred_element_type=jnp.float32)
    net = jnp.maximum(net + b0_ref[...], 0.0)
    out = jnp.dot(net.astype(w1_ref.dtype), w1_ref[...],
                  preferred_element_type=jnp.float32)
    out += b1_ref[...]
    # Residual add of x in full f32 on the VPU (no identity matmul, no quantization).
    pad = o_ref.shape[1] - x.shape[1]                          # static at trace time
    if pad:
        x = jnp.concatenate([x, jnp.zeros((x.shape[0], pad), jnp.float32)], axis=-1)
    out += x
    o_ref[...] = out.astype(o_ref.dtype)


# --------------------------- parameter packing --------------------------------

def pack_params(params, *, compute_dtype=jnp.bfloat16):
    """Transpose / pad / cast module parameters ONCE (outside the hot path).

    params (PyTorch (out, in) convention):
      'w0': (size_h,  size_in), 'b0': (size_h,)
      'w1': (size_out, size_h), 'b1': (size_out,)
      'ws': (size_out, size_in) or None   (bias-free shortcut; None => identity)

    compute_dtype is used for the MXU operands (bf16 default, f32 accumulation).
    """
    size_h, size_in = params["w0"].shape
    size_out = params["w1"].shape[0]
    h_p = _round_up(size_h, 128)       # lane-dense hidden dim
    out_p = _round_up(size_out, 128)   # lane-dense output (store) dim

    def pad2(a, rows, cols):
        return jnp.pad(a, ((0, rows - a.shape[0]), (0, cols - a.shape[1])))

    return {
        "w0t": pad2(params["w0"].T, size_in, h_p).astype(compute_dtype),   # (size_in, h_p)
        "b0": jnp.pad(params["b0"], (0, h_p - size_h)).reshape(1, h_p).astype(jnp.float32),
        "w1t": pad2(params["w1"].T, h_p, out_p).astype(compute_dtype),     # (h_p, out_p)
        "b1": jnp.pad(params["b1"], (0, out_p - size_out)).reshape(1, out_p).astype(jnp.float32),
        "wst": (None if params["ws"] is None
                else pad2(params["ws"].T, size_in, out_p).astype(compute_dtype)),
        "size_out": size_out,
    }


def _vmem_capacity_bytes():
    try:
        return int(pltpu.get_tpu_info().vmem_capacity_bytes)
    except Exception:
        return 64 * 1024 * 1024   # conservative default (v7x per-TC VMEM)


# ------------------------------ wrapper ---------------------------------------

def resnet_block_fc(x, packed, *, tm=1024):
    """Apply ResnetBlockFC to x of shape (..., size_in) using packed params."""
    orig_shape = x.shape
    if x.ndim != 2:
        x = x.reshape(-1, orig_shape[-1])
    N, size_in = x.shape
    assert size_in == packed["w0t"].shape[0], "size_in mismatch with packed params"

    size_out = packed["size_out"]
    h_p = packed["w0t"].shape[1]
    out_p = packed["w1t"].shape[1]
    identity = packed["wst"] is None
    out_dtype = x.dtype

    c_bytes = jnp.dtype(packed["w0t"].dtype).itemsize
    x_bytes = jnp.dtype(x.dtype).itemsize
    o_bytes = jnp.dtype(out_dtype).itemsize

    # Resident weight/bias footprint (x2 budget in case single-buffering is unavailable).
    w_bytes = c_bytes * (size_in * h_p + h_p * out_p
                         + (0 if identity else size_in * out_p)) + 4 * (h_p + out_p)

    # ---- choose tm against the chip's VMEM capacity --------------------------
    cap = _vmem_capacity_bytes()
    budget = min(int(cap * 0.7), 100 * 1024 * 1024)

    def vmem_need(t):
        tiles = 2 * t * size_in * x_bytes + 2 * t * out_p * o_bytes   # double-buffered I/O tiles
        f32_tmp = 4 * t * (size_in + h_p + 2 * out_p)                 # in-kernel f32 values
        return tiles + f32_tmp + 2 * w_bytes

    tm = max(8, min(_round_up(tm, 8), _round_up(N, 8)))
    while tm > 8 and vmem_need(tm) > budget:
        tm = max(8, _round_up(tm // 2, 8))
    # Keep the "parallel" grid >= 2 blocks so both TensorCores can get work.
    if N > 8 and pl.cdiv(N, tm) < 2:
        tm = max(8, _round_up(pl.cdiv(N, 2), 8))

    grid = (pl.cdiv(N, tm),)
    vmem_limit = int(max(32 * 1024 * 1024,
                         min(cap - (8 << 20), vmem_need(tm) + (8 << 20))))

    # ---- build pallas_call ----------------------------------------------------
    def build_call(single_buffer_weights):
        if single_buffer_weights:
            const = lambda shape: pl.BlockSpec(shape, lambda i: (0, 0),
                                               pipeline_mode=pl.Buffered(1))
        else:
            const = lambda shape: pl.BlockSpec(shape, lambda i: (0, 0))

        if identity:
            kernel = _resnet_kernel_identity
            operands = (x, packed["w0t"], packed["b0"], packed["w1t"], packed["b1"])
        else:
            kernel = _resnet_kernel_linear
            operands = (x, packed["w0t"], packed["b0"], packed["w1t"],
                        packed["wst"], packed["b1"])

        in_specs = [pl.BlockSpec((tm, size_in), lambda i: (i, 0))]
        in_specs += [const(op.shape) for op in operands[1:]]

        call = pl.pallas_call(
            kernel,
            out_shape=jax.ShapeDtypeStruct((N, out_p), out_dtype),
            grid_spec=pltpu.PrefetchScalarGridSpec(
                num_scalar_prefetch=0,
                grid=grid,
                in_specs=in_specs,
                out_specs=pl.BlockSpec((tm, out_p), lambda i: (i, 0)),
            ),
            compiler_params=pltpu.CompilerParams(
                dimension_semantics=("parallel",),
                vmem_limit_bytes=vmem_limit),
        )
        return call, operands

    try:
        call, operands = build_call(True)
        out = call(*operands)
    except Exception:
        # Fallback if single-buffered weight specs (pl.Buffered(1)) are not
        # supported by this jax/libtpu build; weights are tiny relative to VMEM.
        call, operands = build_call(False)
        out = call(*operands)

    if out_p != size_out:
        out = out[:, :size_out]
    if len(orig_shape) != 2:
        out = out.reshape(*orig_shape[:-1], size_out)
    return out


# --------------------------- parameter init -----------------------------------

def init_params(key, size_in, size_out=None, size_h=None):
    """Synthetic init matching the module's parameter shapes.

    fc_1 weight is zero-initialized exactly as in the PyTorch module
    (nn.init.zeros_(self.fc_1.weight)); other params use uniform init.
    """
    if size_out is None:
        size_out = size_in
    if size_h is None:
        size_h = min(size_in, size_out)

    k0w, k0b, k1b, ksw = jax.random.split(key, 4)
    bound0 = 1.0 / jnp.sqrt(size_in)
    bound1 = 1.0 / jnp.sqrt(size_h)

    return {
        "w0": jax.random.uniform(k0w, (size_h, size_in), jnp.float32, -bound0, bound0),
        "b0": jax.random.uniform(k0b, (size_h,), jnp.float32, -bound0, bound0),
        "w1": jnp.zeros((size_out, size_h), jnp.float32),   # nn.init.zeros_
        "b1": jax.random.uniform(k1b, (size_out,), jnp.float32, -bound1, bound1),
        "ws": (None if size_in == size_out else
               jax.random.uniform(ksw, (size_out, size_in), jnp.float32, -bound0, bound0)),
    }


def reference_forward(x, params):
    """Pure-JAX reference for correctness check."""
    net = jnp.maximum(x, 0.0) @ params["w0"].T + params["b0"]
    dx = jnp.maximum(net, 0.0) @ params["w1"].T + params["b1"]
    x_s = x if params["ws"] is None else x @ params["ws"].T
    return x_s + dx


# ------------------------------- main ------------------------------------------

if __name__ == "__main__":
    key = jax.random.PRNGKey(0)
    kx1, kx2, kp1, kp2, kw1a, kw1b = jax.random.split(key, 6)

    # ---- Case 1: size_in != size_out (linear shortcut), N not a multiple of tm ----
    N1, size_in1, size_out1 = 300, 32, 64
    x1 = jax.random.normal(kx1, (N1, size_in1), jnp.float32)
    params_sc = init_params(kp1, size_in1, size_out1)
    # Override the zero-initialized fc_1 weight so the hidden path is exercised
    # numerically (the forward must be correct for any weights).
    params_sc["w1"] = jax.random.uniform(
        kw1a, (size_out1, min(size_in1, size_out1)), jnp.float32, -0.2, 0.2)
    ref_sc = reference_forward(x1, params_sc)

    # f32 compute path (tight tolerance); 300 rows -> partial edge block at tm=128.
    packed_f32 = pack_params(params_sc, compute_dtype=jnp.float32)
    out_sc = jax.block_until_ready(resnet_block_fc(x1, packed_f32, tm=128))
    assert out_sc.shape == (N1, size_out1)
    assert jnp.allclose(out_sc, ref_sc, atol=1e-4, rtol=1e-4)

    # Default bf16 MXU-operand path (f32 accumulation + f32 elementwise), loose tol.
    packed_bf16 = pack_params(params_sc)   # compute_dtype=bfloat16 default
    out_bf = jax.block_until_ready(resnet_block_fc(x1, packed_bf16, tm=128))
    assert out_bf.shape == (N1, size_out1)
    assert float(jnp.max(jnp.abs(out_bf - ref_sc))) < 5e-2

    # ---- Case 2: size_in == size_out (identity shortcut, f32 residual add) ----
    N2, size_in2 = 16, 32
    x2 = jax.random.normal(kx2, (N2, size_in2), jnp.float32)
    params_id = init_params(kp2, size_in2, size_in2)
    params_id["w1"] = jax.random.uniform(
        kw1b, (size_in2, size_in2), jnp.float32, -0.2, 0.2)
    ref_id = reference_forward(x2, params_id)

    packed_id = pack_params(params_id, compute_dtype=jnp.float32)
    out_id = jax.block_until_ready(resnet_block_fc(x2, packed_id, tm=1024))
    assert out_id.shape == (N2, size_in2)
    assert jnp.allclose(out_id, ref_id, atol=1e-4, rtol=1e-4)

    print("KERNEL_OK")
</pallas_src>

<mosaic_0001>
module attributes {stable_mosaic.version = 11 : i64} {
  func.func @_resnet_kernel_linear(%arg0: i32, %arg1: memref<128x32xf32, #tpu.memory_space<vmem>>, %arg2: memref<32x128xf32, #tpu.memory_space<vmem>>, %arg3: memref<1x128xf32, #tpu.memory_space<vmem>>, %arg4: memref<128x128xf32, #tpu.memory_space<vmem>>, %arg5: memref<32x128xf32, #tpu.memory_space<vmem>>, %arg6: memref<1x128xf32, #tpu.memory_space<vmem>>, %arg7: memref<128x128xf32, #tpu.memory_space<vmem>>) attributes {dimension_semantics = [#tpu.dimension_semantics<parallel>], iteration_bounds = array<i64: 3>, scalar_prefetch = 0 : i64, scratch_operands = 0 : i64, tpu.core_type = #tpu.core_type<tc>, window_params = [{transform_indices = @transform_0, window_bounds = array<i64: 128, 32>}, {pipeline_mode = #tpu.pipeline_mode<synchronous>, transform_indices = @transform_1, window_bounds = array<i64: 32, 128>}, {pipeline_mode = #tpu.pipeline_mode<synchronous>, transform_indices = @transform_2, window_bounds = array<i64: 1, 128>}, {pipeline_mode = #tpu.pipeline_mode<synchronous>, transform_indices = @transform_3, window_bounds = array<i64: 128, 128>}, {pipeline_mode = #tpu.pipeline_mode<synchronous>, transform_indices = @transform_4, window_bounds = array<i64: 32, 128>}, {pipeline_mode = #tpu.pipeline_mode<synchronous>, transform_indices = @transform_5, window_bounds = array<i64: 1, 128>}, {transform_indices = @transform_6, window_bounds = array<i64: 128, 128>}]} {
    %c0 = arith.constant 0 : index
    %c0_0 = arith.constant 0 : index
    %0 = vector.load %arg1[%c0, %c0_0] : memref<128x32xf32, #tpu.memory_space<vmem>>, vector<128x32xf32>
    %cst = arith.constant 0.000000e+00 : f32
    %1 = vector.broadcast %cst : f32 to vector<128x32xf32>
    %2 = arith.maximumf %0, %1 : vector<128x32xf32>
    %c0_1 = arith.constant 0 : index
    %c0_2 = arith.constant 0 : index
    %3 = vector.load %arg2[%c0_1, %c0_2] : memref<32x128xf32, #tpu.memory_space<vmem>>, vector<32x128xf32>
    %cst_3 = arith.constant dense<0.000000e+00> : vector<128x128xf32>
    %4 = tpu.matmul %2, %3, %cst_3 {dimension_numbers = #tpu.dot_dimension_numbers<[1], [0], [0], [1], [0, 0, 1, 1], [], []>} : vector<128x32xf32>, vector<32x128xf32>, vector<128x128xf32> -> vector<128x128xf32>
    %c0_4 = arith.constant 0 : index
    %c0_5 = arith.constant 0 : index
    %5 = vector.load %arg3[%c0_4, %c0_5] : memref<1x128xf32, #tpu.memory_space<vmem>>, vector<1x128xf32>
    %6 = vector.broadcast %5 : vector<1x128xf32> to vector<128x128xf32>
    %7 = arith.addf %4, %6 : vector<128x128xf32>
    %cst_6 = arith.constant 0.000000e+00 : f32
    %8 = vector.broadcast %cst_6 : f32 to vector<128x128xf32>
    %9 = arith.maximumf %7, %8 : vector<128x128xf32>
    %c0_7 = arith.constant 0 : index
    %c0_8 = arith.constant 0 : index
    %10 = vector.load %arg4[%c0_7, %c0_8] : memref<128x128xf32, #tpu.memory_space<vmem>>, vector<128x128xf32>
    %cst_9 = arith.constant dense<0.000000e+00> : vector<128x128xf32>
    %11 = tpu.matmul %9, %10, %cst_9 {dimension_numbers = #tpu.dot_dimension_numbers<[1], [0], [0], [1], [0, 0, 1, 1], [], []>} : vector<128x128xf32>, vector<128x128xf32>, vector<128x128xf32> -> vector<128x128xf32>
    %c0_10 = arith.constant 0 : index
    %c0_11 = arith.constant 0 : index
    %12 = vector.load %arg5[%c0_10, %c0_11] : memref<32x128xf32, #tpu.memory_space<vmem>>, vector<32x128xf32>
    %cst_12 = arith.constant dense<0.000000e+00> : vector<128x128xf32>
    %13 = tpu.matmul %0, %12, %cst_12 {dimension_numbers = #tpu.dot_dimension_numbers<[1], [0], [0], [1], [0, 0, 1, 1], [], []>} : vector<128x32xf32>, vector<32x128xf32>, vector<128x128xf32> -> vector<128x128xf32>
    %14 = arith.addf %11, %13 : vector<128x128xf32>
    %c0_13 = arith.constant 0 : index
    %c0_14 = arith.constant 0 : index
    %15 = vector.load %arg6[%c0_13, %c0_14] : memref<1x128xf32, #tpu.memory_space<vmem>>, vector<1x128xf32>
    %16 = vector.broadcast %15 : vector<1x128xf32> to vector<128x128xf32>
    %17 = arith.addf %14, %16 : vector<128x128xf32>
    %c0_15 = arith.constant 0 : index
    %c0_16 = arith.constant 0 : index
    %18 = vector.load %arg7[%c0_15, %c0_16] : memref<128x128xf32, #tpu.memory_space<vmem>>, vector<128x128xf32>
    tpu.vector_store %arg7[%c0_15, %c0_16], %17 {strides = array<i32>} : memref<128x128xf32, #tpu.memory_space<vmem>>, vector<128x128xf32>,
    return
  }
  func.func @transform_0(%arg0: i32) -> (i32, i32) {
    %c0_i32 = arith.constant 0 : i32
    %c0_i32_0 = arith.constant 0 : i32
    return %arg0, %c0_i32 : i32, i32
  }
  func.func @transform_1(%arg0: i32) -> (i32, i32) {
    %c0_i32 = arith.constant 0 : i32
    %c0_i32_0 = arith.constant 0 : i32
    %c0_i32_1 = arith.constant 0 : i32
    return %c0_i32, %c0_i32_0 : i32, i32
  }
  func.func @transform_2(%arg0: i32) -> (i32, i32) {
    %c0_i32 = arith.constant 0 : i32
    %c0_i32_0 = arith.constant 0 : i32
    %c0_i32_1 = arith.constant 0 : i32
    return %c0_i32, %c0_i32_0 : i32, i32
  }
  func.func @transform_3(%arg0: i32) -> (i32, i32) {
    %c0_i32 = arith.constant 0 : i32
    %c0_i32_0 = arith.constant 0 : i32
    %c0_i32_1 = arith.constant 0 : i32
    return %c0_i32, %c0_i32_0 : i32, i32
  }
  func.func @transform_4(%arg0: i32) -> (i32, i32) {
    %c0_i32 = arith.constant 0 : i32
    %c0_i32_0 = arith.constant 0 : i32
    %c0_i32_1 = arith.constant 0 : i32
    return %c0_i32, %c0_i32_0 : i32, i32
  }
  func.func @transform_5(%arg0: i32) -> (i32, i32) {
    %c0_i32 = arith.constant 0 : i32
    %c0_i32_0 = arith.constant 0 : i32
    %c0_i32_1 = arith.constant 0 : i32
    return %c0_i32, %c0_i32_0 : i32, i32
  }
  func.func @transform_6(%arg0: i32) -> (i32, i32) {
    %c0_i32 = arith.constant 0 : i32
    %c0_i32_0 = arith.constant 0 : i32
    return %arg0, %c0_i32 : i32, i32
  }
}

module attributes {stable_mosaic.version = 11 : i64} {
  func.func @_resnet_kernel_linear(%arg0: i32, %arg1: memref<128x32xf32, #tpu.memory_space<vmem>>, %arg2: memref<32x128xf32, #tpu.memory_space<vmem>>, %arg3: memref<1x128xf32, #tpu.memory_space<vmem>>, %arg4: memref<128x128xf32, #tpu.memory_space<vmem>>, %arg5: memref<32x128xf32, #tpu.memory_space<vmem>>, %arg6: memref<1x128xf32, #tpu.memory_space<vmem>>, %arg7: memref<128x128xf32, #tpu.memory_space<vmem>>) attributes {dimension_semantics = [#tpu.dimension_semantics<parallel>], iteration_bounds = array<i64: 3>, scalar_prefetch = 0 : i64, scratch_operands = 0 : i64, tpu.core_type = #tpu.core_type<tc>, window_params = [{transform_indices = @transform_0, window_bounds = array<i64: 128, 32>}, {pipeline_mode = #tpu.pipeline_mode<synchronous>, transform_indices = @transform_1, window_bounds = array<i64: 32, 128>}, {pipeline_mode = #tpu.pipeline_mode<synchronous>, transform_indices = @transform_2, window_bounds = array<i64: 1, 128>}, {pipeline_mode = #tpu.pipeline_mode<synchronous>, transform_indices = @transform_3, window_bounds = array<i64: 128, 128>}, {pipeline_mode = #tpu.pipeline_mode<synchronous>, transform_indices = @transform_4, window_bounds = array<i64: 32, 128>}, {pipeline_mode = #tpu.pipeline_mode<synchronous>, transform_indices = @transform_5, window_bounds = array<i64: 1, 128>}, {transform_indices = @transform_6, window_bounds = array<i64: 128, 128>}]} {
    %c0 = arith.constant 0 : index
    %c0_0 = arith.constant 0 : index
    %0 = vector.load %arg1[%c0, %c0_0] : memref<128x32xf32, #tpu.memory_space<vmem>>, vector<128x32xf32>
    %cst = arith.constant 0.000000e+00 : f32
    %1 = vector.broadcast %cst : f32 to vector<128x32xf32>
    %2 = arith.maximumf %0, %1 : vector<128x32xf32>
    %c0_1 = arith.constant 0 : index
    %c0_2 = arith.constant 0 : index
    %3 = vector.load %arg2[%c0_1, %c0_2] : memref<32x128xf32, #tpu.memory_space<vmem>>, vector<32x128xf32>
    %cst_3 = arith.constant dense<0.000000e+00> : vector<128x128xf32>
    %4 = tpu.matmul %2, %3, %cst_3 {dimension_numbers = #tpu.dot_dimension_numbers<[1], [0], [0], [1], [0, 0, 1, 1], [], []>} : vector<128x32xf32>, vector<32x128xf32>, vector<128x128xf32> -> vector<128x128xf32>
    %c0_4 = arith.constant 0 : index
    %c0_5 = arith.constant 0 : index
    %5 = vector.load %arg3[%c0_4, %c0_5] : memref<1x128xf32, #tpu.memory_space<vmem>>, vector<1x128xf32>
    %6 = vector.broadcast %5 : vector<1x128xf32> to vector<128x128xf32>
    %7 = arith.addf %4, %6 : vector<128x128xf32>
    %cst_6 = arith.constant 0.000000e+00 : f32
    %8 = vector.broadcast %cst_6 : f32 to vector<128x128xf32>
    %9 = arith.maximumf %7, %8 : vector<128x128xf32>
    %c0_7 = arith.constant 0 : index
    %c0_8 = arith.constant 0 : index
    %10 = vector.load %arg4[%c0_7, %c0_8] : memref<128x128xf32, #tpu.memory_space<vmem>>, vector<128x128xf32>
    %cst_9 = arith.constant dense<0.000000e+00> : vector<128x128xf32>
    %11 = tpu.matmul %9, %10, %cst_9 {dimension_numbers = #tpu.dot_dimension_numbers<[1], [0], [0], [1], [0, 0, 1, 1], [], []>} : vector<128x128xf32>, vector<128x128xf32>, vector<128x128xf32> -> vector<128x128xf32>
    %c0_10 = arith.constant 0 : index
    %c0_11 = arith.constant 0 : index
    %12 = vector.load %arg5[%c0_10, %c0_11] : memref<32x128xf32, #tpu.memory_space<vmem>>, vector<32x128xf32>
    %cst_12 = arith.constant dense<0.000000e+00> : vector<128x128xf32>
    %13 = tpu.matmul %0, %12, %cst_12 {dimension_numbers = #tpu.dot_dimension_numbers<[1], [0], [0], [1], [0, 0, 1, 1], [], []>} : vector<128x32xf32>, vector<32x128xf32>, vector<128x128xf32> -> vector<128x128xf32>
    %14 = arith.addf %11, %13 : vector<128x128xf32>
    %c0_13 = arith.constant 0 : index
    %c0_14 = arith.constant 0 : index
    %15 = vector.load %arg6[%c0_13, %c0_14] : memref<1x128xf32, #tpu.memory_space<vmem>>, vector<1x128xf32>
    %16 = vector.broadcast %15 : vector<1x128xf32> to vector<128x128xf32>
    %17 = arith.addf %14, %16 : vector<128x128xf32>
    %c0_15 = arith.constant 0 : index
    %c0_16 = arith.constant 0 : index
    %18 = vector.load %arg7[%c0_15, %c0_16] : memref<128x128xf32, #tpu.memory_space<vmem>>, vector<128x128xf32>
    tpu.vector_store %arg7[%c0_15, %c0_16], %17 {strides = array<i32>} : memref<128x128xf32, #tpu.memory_space<vmem>>, vector<128x128xf32>,
    return
  }
  func.func @transform_0(%arg0: i32) -> (i32, i32) {
    %c0_i32 = arith.constant 0 : i32
    %c0_i32_0 = arith.constant 0 : i32
    return %arg0, %c0_i32 : i32, i32
  }
  func.func @transform_1(%arg0: i32) -> (i32, i32) {
    %c0_i32 = arith.constant 0 : i32
    %c0_i32_0 = arith.constant 0 : i32
    %c0_i32_1 = arith.constant 0 : i32
    return %c0_i32, %c0_i32_0 : i32, i32
  }
  func.func @transform_2(%arg0: i32) -> (i32, i32) {
    %c0_i32 = arith.constant 0 : i32
    %c0_i32_0 = arith.constant 0 : i32
    %c0_i32_1 = arith.constant 0 : i32
    return %c0_i32, %c0_i32_0 : i32, i32
  }
  func.func @transform_3(%arg0: i32) -> (i32, i32) {
    %c0_i32 = arith.constant 0 : i32
    %c0_i32_0 = arith.constant 0 : i32
    %c0_i32_1 = arith.constant 0 : i32
    return %c0_i32, %c0_i32_0 : i32, i32
  }
  func.func @transform_4(%arg0: i32) -> (i32, i32) {
    %c0_i32 = arith.constant 0 : i32
    %c0_i32_0 = arith.constant 0 : i32
    %c0_i32_1 = arith.constant 0 : i32
    return %c0_i32, %c0_i32_0 : i32, i32
  }
  func.func @transform_5(%arg0: i32) -> (i32, i32) {
    %c0_i32 = arith.constant 0 : i32
    %c0_i32_0 = arith.constant 0 : i32
    %c0_i32_1 = arith.constant 0 : i32
    return %c0_i32, %c0_i32_0 : i32, i32
  }
  func.func @transform_6(%arg0: i32) -> (i32, i32) {
    %c0_i32 = arith.constant 0 : i32
    %c0_i32_0 = arith.constant 0 : i32
    return %arg0, %c0_i32 : i32, i32
  }
}

</mosaic_0001>

<bundles_post_ra>
// kernel: tpu_custom_call.1
= control target key start
LH: loop header
LB: loop body
LE: loop exit
PB: predicated region body
PF: predicated region fallthrough
CT: control target
= control target key end

     0   :  { %11 = vsyncpa [#allocation3], 0  ;;  %s1784_s0 = inlined_call_operand.vmem [shape: f32[300,32], index: 0, kind: input, shape index: {}]   ;;  %s1785_s1 = inlined_call_operand.vmem [shape: f32[32,128], index: 1, kind: input, shape index: {}]   ;;  %s1786_s2 = inlined_call_operand.vmem [shape: f32[1,128], index: 2, kind: input, shape index: {}]   ;;  %s1787_s3 = inlined_call_operand.vmem [shape: f32[128,128], index: 3, kind: input, shape index: {}]   ;;  %s1788_s4 = inlined_call_operand.vmem [shape: f32[32,128], index: 4, kind: input, shape index: {}]   ;;  %s1789_s5 = inlined_call_operand.vmem [shape: f32[1,128], index: 5, kind: input, shape index: {}]   ;;  %s1790_s6 = inlined_call_operand.hbm [shape: f32[300,128], index: 6, kind: output, shape index: {}]  }
   0x1   :  { %13 = vsyncpa [#allocation3 + $0x1], 0  ;;  %s1474_s21 = smov 0   ;;  %s1476_s22 = smov 0  }
   0x2   :  { %s1478_s23 = smov 0   ;;  %s1480_s24 = smov 0  }
   0x3 LB: > { %s1495_s25 = sadd.s32 4294967295, %s1434_s24   ;;  %s1009_s26 = sadd.s32 4294967294, %s1434_s24   ;;  %s1434_s24 = sphi %s1480_s24, %s1796_s24   ;;  %s1430_s23 = sphi %s1478_s23, %s1795_s23   ;;  %s1426_s22 = sphi %s1476_s22, %s1794_s22   ;;  %s1422_s21 = sphi %s1474_s21, %s1793_s21  }
   0x4   : > { %s1499_s27 = sadd.s32 1, %s1434_s24   ;;  %s157_s28 = sadd.s32 1, %s1430_s23 }
   0x5   : > { %s154_s29 = ssub.s32 %s1434_s24, %s1499_s27  ;;  %p167_p0 = scmp.ne.s32.totalorder %s1430_s23, %s1426_s22 }
   0x6   : > { %p155_p1 = scmp.eq.s32.totalorder %s154_s29, 0  ;;  %p168_p2 = scmp.eq.s32.totalorder %s1495_s25, 2 }
   0x7   : > { %p173_p3 = scmp.ne.s32.totalorder %s1426_s22, %s1422_s21  ;;  %p174_p4 = scmp.eq.s32.totalorder %s1009_s26, 2 }
   0x8   : > { %s1510_s30 = scalar_select %p155_p1, %s1430_s23, %s157_s28  }
   0x9   : > { %p1512_p5 = por %p168_p2, %p167_p0  ;;  %p1516_p6 = por %p174_p4, %p173_p3 }
   0xa   : > { %p1012_p7 = scmp.ge.s32.totalorder %s1434_s24, 1  ;;  %p224_p8 = scmp.lt.s32.totalorder %s1434_s24, 4 }
   0xc   : > { %p225_p9 = pnand %p1012_p7, %p224_p8 }
   0xd   : > { %v309_v0 = vld [vmem:[%s1785_s1] sm:$0xff] (!%p225_p9)  ;;  %v310_v1 = vld [vmem:[%s1785_s1 + $0x8] sm:$0xff] (!%p225_p9)  ;;  %v311_v2 = vld [vmem:[%s1785_s1 + $0x10] sm:$0xff] (!%p225_p9)  ;;  %s1532_s15 = sshll.u32 (!%p225_p9), %s1495_s25, 4  ;;  %vm320_vm0 = vcmask (!%p225_p9), 261120   ;;  %s255_s10 = sand.u32 (!%p225_p9), 1, %s1426_s22  }
   0xe   : > { %228 = sbr.rel (%p225_p9) target bundleno = 519 (0x207), region = 44  ;;  %v1252_v3 = vpack.c.bf16 (!%p225_p9), %v310_v1, %v309_v0  ;;  %v312_v4 = vld [vmem:[%s1785_s1 + $0x18] sm:$0xff] (!%p225_p9)  ;;  %p263_p10 = scmp.lt.s32.totalorder (!%p225_p9), %s1532_s15, 37  ;;  %v530_v6 = vld [vmem:[%s1787_s3] sm:$0xff] (!%p225_p9)  ;;  %v531_v7 = vld [vmem:[%s1787_s3 + $0x8] sm:$0xff] (!%p225_p9) }
   0xf   : > { %v1256_v5 = vpack.c.bf16 (!%p225_p9), %v312_v4, %v311_v2  ;;  %v546_v8 = vld [vmem:[%s1788_s4] sm:$0xff] (!%p225_p9)  ;;  %v547_v9 = vld [vmem:[%s1788_s4 + $0x8] sm:$0xff] (!%p225_p9)  ;;  %v548_v11 = vld [vmem:[%s1788_s4 + $0x10] sm:$0xff] (!%p225_p9)  ;;  %v1268_v13 = vpack.c.bf16 (!%p225_p9), %v531_v7, %v530_v6  ;;  %s1723_s14 = scalar_lea.sflag (!%p225_p9), [#allocation3], %s255_s10 }
  0x10   : > { %1253 = vmatprep.subr.bf16.mxu0 (!%p225_p9), %v1252_v3  ;;  %v1260_v10 = vpack.c.bf16 (!%p225_p9), %v547_v9, %v546_v8  ;;  %v549_v12 = vld [vmem:[%s1788_s4 + $0x18] sm:$0xff] (!%p225_p9)  ;;  %v532_v15 = vld [vmem:[%s1787_s3 + $0x10] sm:$0xff] (!%p225_p9)  ;;  %v534_v26 = vld [vmem:[%s1787_s3 + $0x20] sm:$0xff] (!%p225_p9) }
  0x11   : > { %1255 = vmatpush3.bf16.msra.mxu0 (!%p225_p9), %v1252_v3  ;;  %v1264_v14 = vpack.c.bf16 (!%p225_p9), %v549_v12, %v548_v11  ;;  %v533_v16 = vld [vmem:[%s1787_s3 + $0x18] sm:$0xff] (!%p225_p9)  ;;  %v535_v27 = vld [vmem:[%s1787_s3 + $0x28] sm:$0xff] (!%p225_p9)  ;;  %v536_v33 = vld [vmem:[%s1787_s3 + $0x30] sm:$0xff] (!%p225_p9) }
  0x12   : > { %1257 = vmatprep.subr.bf16.mxu0 (!%p225_p9), %v1256_v5  ;;  %1261 = vmatprep.subr.bf16.mxu1 (!%p225_p9), %v1260_v10  ;;  %v1272_v25 = vpack.c.bf16 (!%p225_p9), %v533_v16, %v532_v15  ;;  %v1276_v32 = vpack.c.bf16 (!%p225_p9), %v535_v27, %v534_v26  ;;  %v537_v34 = vld [vmem:[%s1787_s3 + $0x38] sm:$0xff] (!%p225_p9)  ;;  %v538_v40 = vld [vmem:[%s1787_s3 + $0x40] sm:$0xff] (!%p225_p9)  ;;  %v539_v41 = vld [vmem:[%s1787_s3 + $0x48] sm:$0xff] (!%p225_p9) }
  0x13   : > { %1263 = vmatpush3.bf16.msra.mxu1 (!%p225_p9), %v1260_v10  ;;  %v1280_v39 = vpack.c.bf16 (!%p225_p9), %v537_v34, %v536_v33  ;;  %v1284_v46 = vpack.c.bf16 (!%p225_p9), %v539_v41, %v538_v40  ;;  %v540_v47 = vld [vmem:[%s1787_s3 + $0x50] sm:$0xff] (!%p225_p9)  ;;  %v541_v48 = vld [vmem:[%s1787_s3 + $0x58] sm:$0xff] (!%p225_p9)  ;;  %v542_v54 = vld [vmem:[%s1787_s3 + $0x60] sm:$0xff] (!%p225_p9) }
  0x14   : > { %1265 = vmatprep.subr.bf16.mxu1 (!%p225_p9), %v1264_v14  ;;  %v1288_v53 = vpack.c.bf16 (!%p225_p9), %v541_v48, %v540_v47  ;;  %v543_v55 = vld [vmem:[%s1787_s3 + $0x68] sm:$0xff] (!%p225_p9)  ;;  %v544_v1 = vld [vmem:[%s1787_s3 + $0x70] sm:$0xff] (!%p225_p9)  ;;  %v545_v2 = vld [vmem:[%s1787_s3 + $0x78] sm:$0xff] (!%p225_p9) }
  0x15   : > { %s264_s9 = scalar_select %p263_p10, %s1532_s15, 37  ;;  %1259 = vmatpush3.bf16.msra.mxu0 %v1256_v5  ;;  %v1292_v60 = vpack.c.bf16 %v543_v55, %v542_v54  ;;  %v1296_v3 = vpack.c.bf16 %v545_v2, %v544_v1  ;;  %v1655_v4 = vld [vmem:[%s1786_s2] ss:$0 sm:$0xff] }
  0x16   : > { %1269 = vmatprep.subr.bf16.mxu0 %v1268_v13  ;;  %s936_s16 = ssub.s32 (%p1512_p5), 38, %s1532_s15 }
  0x17   : > { %s1015_s17 = sshll.u32 %s264_s9, 3  ;;  %1267 = vmatpush3.bf16.msra.mxu1 %v1264_v14  ;;  %s1013_s9 = sshll.u32 %s255_s10, 7 }
  0x18   : > { %s1560_s20 = scalar_lea.vmem %s1784_s0, %s1015_s17  ;;  %1300 = vmatprep.subr.bf16.mxu1 %v1268_v13  ;;  %s1697_s13 = scalar_lea.vmem [#allocation2], %s1013_s9 }
  0x19   : > { %v277_v17 = vld [vmem:[%s1560_s20] sm:$0xff]  ;;  %v278_v18 = vld [vmem:[%s1560_s20 + $0x8] sm:$0xff]  ;;  %v279_v19 = vld [vmem:[%s1560_s20 + $0x10] sm:$0xff]  ;;  %p937_p11 = scmp.lt.s32.totalorder (%p1512_p5), %s936_s16, 16 }
  0x1a   : > { %v293_v20 = vmax.f32 %v277_v17, 0.0  ;;  %v294_v21 = vmax.f32 %v278_v18, 0.0  ;;  %v295_v22 = vmax.f32 %v279_v19, 0.0  ;;  %v280_v23 = vld [vmem:[%s1560_s20 + $0x18] sm:$0xff]  ;;  %v281_v24 = vld [vmem:[%s1560_s20 + $0x20] sm:$0xff]  ;;  %1172 = vmatprep.mubr.msk.f32.mxu1 %vm320_vm0, %v277_v17  ;;  %v282_v30 = vld [vmem:[%s1560_s20 + $0x28] sm:$0xff] }
  0x1b   : > { %v296_v28 = vmax.f32 %v280_v23, 0.0  ;;  %v297_v29 = vmax.f32 %v281_v24, 0.0  ;;  %v283_v31 = vld [vmem:[%s1560_s20 + $0x30] sm:$0xff]  ;;  %1173 = vmatmul.mubr.msk.f32.vlgmr.msra.gmra.mrb[0].mxu1 %vm320_vm0, %v278_v18  ;;  %v298_v35 = vmax.f32 %v282_v30, 0.0  ;;  %v284_v37 = vld [vmem:[%s1560_s20 + $0x38] sm:$0xff]  ;;  %v285_v38 = vld [vmem:[%s1560_s20 + $0x40] sm:$0xff] }
  0x1c   : > { %1140 = vmatprep.mubr.msk.f32.mxu0 %vm320_vm0, %v293_v20  ;;  %1308 = vmatpush3.bf16.msra.mxu1 %v1268_v13  ;;  %v299_v36 = vmax.f32 %v283_v31, 0.0  ;;  %v300_v42 = vmax.f32 %v284_v37, 0.0  ;;  %v301_v43 = vmax.f32 %v285_v38, 0.0  ;;  %v286_v44 = vld [vmem:[%s1560_s20 + $0x48] sm:$0xff]  ;;  %v287_v45 = vld [vmem:[%s1560_s20 + $0x50] sm:$0xff]  ;;  %v288_v51 = vld [vmem:[%s1560_s20 + $0x58] sm:$0xff] }
  0x1d   : > { %1141 = vmatmul.mubr.msk.f32.vlgmr.msra.gmra.mrb[0].mxu0 %vm320_vm0, %v294_v21  ;;  %1175 = vmatprep.mubr.msk.f32.mxu1 %vm320_vm0, %v279_v19  ;;  %v302_v49 = vmax.f32 %v286_v44, 0.0  ;;  %v303_v50 = vmax.f32 %v287_v45, 0.0  ;;  %v289_v52 = vld [vmem:[%s1560_s20 + $0x60] sm:$0xff]  ;;  %v304_v56 = vmax.f32 %v288_v51, 0.0  ;;  %v290_v58 = vld [vmem:[%s1560_s20 + $0x68] sm:$0xff]  ;;  %v291_v59 = vld [vmem:[%s1560_s20 + $0x70] sm:$0xff] }
  0x1e   : > { %1143 = vmatprep.mubr.msk.f32.mxu0 %vm320_vm0, %v295_v22  ;;  %1271 = vmatpush3.bf16.msra.mxu0 %v1268_v13  ;;  %v305_v57 = vmax.f32 %v289_v52, 0.0  ;;  %v306_v61 = vmax.f32 %v290_v58, 0.0  ;;  %v307_v62 = vmax.f32 %v291_v59, 0.0  ;;  %v292_v63 = vld [vmem:[%s1560_s20 + $0x78] sm:$0xff] }
  0x1f   : > { %1273 = vmatprep.subr.bf16.mxu0 %v1272_v25  ;;  %1176 = vmatmul.mubr.msk.f32.gmra.mrb[2].mxu1 %vm320_vm0, %v280_v23  ;;  %v308_v0 = vmax.f32 %v292_v63, 0.0 }
  0x20   : > { %1301 = vmatprep.subr.bf16.mxu1 %v1272_v25  ;;  %1178 = vmatprep.mubr.msk.f32.mxu1 %vm320_vm0, %v281_v24 }
  0x21   : > { %1144 = vmatmul.mubr.msk.f32.gmra.mrb[2].mxu0 %vm320_vm0, %v296_v28  ;;  %1309 = vmatpush3.bf16.msra.mxu1 %v1272_v25 }
  0x22   : > { %1146 = vmatprep.mubr.msk.f32.mxu0 %vm320_vm0, %v297_v29  ;;  %1275 = vmatpush3.bf16.msra.mxu0 %v1272_v25 }
  0x23   : > { %1277 = vmatprep.subr.bf16.mxu0 %v1276_v32  ;;  %1179 = vmatmul.mubr.msk.f32.gmra.mrb[4].mxu1 %vm320_vm0, %v282_v30 }
  0x24   : > { %1302 = vmatprep.subr.bf16.mxu1 %v1276_v32  ;;  %1181 = vmatprep.mubr.msk.f32.mxu1 %vm320_vm0, %v283_v31 }
  0x25   : > { %1147 = vmatmul.mubr.msk.f32.gmra.mrb[4].mxu0 %vm320_vm0, %v298_v35  ;;  %1310 = vmatpush3.bf16.msra.mxu1 %v1276_v32 }
  0x26   : > { %1149 = vmatprep.mubr.msk.f32.mxu0 %vm320_vm0, %v299_v36  ;;  %1279 = vmatpush3.bf16.msra.mxu0 %v1276_v32 }
  0x27   : > { %1281 = vmatprep.subr.bf16.mxu0 %v1280_v39  ;;  %1182 = vmatmul.mubr.msk.f32.gmra.mrb[6].mxu1 %vm320_vm0, %v284_v37 }
  0x28   : > { %1303 = vmatprep.subr.bf16.mxu1 %v1280_v39  ;;  %1184 = vmatprep.mubr.msk.f32.mxu1 %vm320_vm0, %v285_v38 }
  0x29   : > { %1150 = vmatmul.mubr.msk.f32.gmra.mrb[6].mxu0 %vm320_vm0, %v300_v42  ;;  %1311 = vmatpush3.bf16.msra.mxu1 %v1280_v39 }
  0x2a   : > { %1152 = vmatprep.mubr.msk.f32.mxu0 %vm320_vm0, %v301_v43  ;;  %1283 = vmatpush3.bf16.msra.mxu0 %v1280_v39 }
  0x2b   : > { %1285 = vmatprep.subr.bf16.mxu0 %v1284_v46  ;;  %1304 = vmatprep.subr.bf16.mxu1 %v1284_v46 }
  0x2c   : > { %1185 = vmatmul.mubr.msk.f32.gmra.mrb[8].mxu1 %vm320_vm0, %v286_v44 }
  0x2d   : > { %1153 = vmatmul.mubr.msk.f32.gmra.mrb[8].mxu0 %vm320_vm0, %v302_v49  ;;  %1312 = vmatpush3.bf16.msra.mxu1 %v1284_v46 }
  0x2e   : > { %1155 = vmatprep.mubr.msk.f32.mxu0 %vm320_vm0, %v303_v50  ;;  %1287 = vmatpush3.bf16.msra.mxu0 %v1284_v46 }
  0x2f   : > { %1289 = vmatprep.subr.bf16.mxu0 %v1288_v53  ;;  %1187 = vmatprep.mubr.msk.f32.mxu1 %vm320_vm0, %v287_v45 }
  0x30   : > { %1305 = vmatprep.subr.bf16.mxu1 %v1288_v53  ;;  %1188 = vmatmul.mubr.msk.f32.gmra.mrb[10].mxu1 %vm320_vm0, %v288_v51 }
  0x31   : > { %1156 = vmatmul.mubr.msk.f32.gmra.mrb[10].mxu0 %vm320_vm0, %v304_v56  ;;  %1313 = vmatpush3.bf16.msra.mxu1 %v1288_v53 }
  0x32   : > { %1158 = vmatprep.mubr.msk.f32.mxu0 %vm320_vm0, %v305_v57  ;;  %1291 = vmatpush3.bf16.msra.mxu0 %v1288_v53 }
  0x33   : > { %1293 = vmatprep.subr.bf16.mxu0 %v1292_v60  ;;  %1190 = vmatprep.mubr.msk.f32.mxu1 %vm320_vm0, %v289_v52 }
  0x34   : > { %1306 = vmatprep.subr.bf16.mxu1 %v1292_v60  ;;  %1191 = vmatmul.mubr.msk.f32.gmra.mrb[12].mxu1 %vm320_vm0, %v290_v58 }
  0x35   : > { %1159 = vmatmul.mubr.msk.f32.gmra.mrb[12].mxu0 %vm320_vm0, %v306_v61  ;;  %1314 = vmatpush3.bf16.msra.mxu1 %v1292_v60 }
  0x36   : > { %1161 = vmatprep.mubr.msk.f32.mxu0 %vm320_vm0, %v307_v62  ;;  %1295 = vmatpush3.bf16.msra.mxu0 %v1292_v60  ;;  %v1049_v62 = vld [vmem:[%s1789_s5] ss:$0 sm:$0xff] }
  0x37   : > { %1193 = vmatprep.mubr.msk.f32.mxu1 %vm320_vm0, %v291_v59  ;;  %1297 = vmatprep.subr.bf16.mxu0 %v1296_v3 }
  0x38   : > { %1194 = vmatmul.mubr.msk.f32.gmra.mrb[14].mxu1 %vm320_vm0, %v292_v63  ;;  %1307 = vmatprep.subr.bf16.mxu1 %v1296_v3 }
  0x39   : > { %1162 = vmatmul.mubr.msk.f32.gmra.mrb[14].mxu0 %vm320_vm0, %v308_v0  ;;  %1315 = vmatpush3.bf16.msra.mxu1 %v1296_v3 }
  0x3a   : > { %1299 = vmatpush3.bf16.msra.mxu0 %v1296_v3 }
  0xee   : > { %v1659_v9 = vpop.f32.mrb[0].mxu1 }
  0xef   : > { %v1661_v12 = vpop.f32.mrb[1].mxu1 }
  0xf0   : > { %v1142_v5 = vpop.f32.mrb[0].mxu0 }
  0xf1   : > { %v441_v6 = vadd.f32 %v1142_v5, %v1655_v4  ;;  %v435_v7 = vpop.f32.mrb[1].mxu0 }
  0xf2   : > { %v436_v8 = vadd.f32 %v1655_v4, %v435_v7  ;;  %v1665_v17 = vpop.f32.mrb[2].mxu1 }
  0xf3   : > { %v515_v13 = vmax.f32 %v441_v6, 0.0  ;;  %v1667_v20 = vpop.f32.mrb[3].mxu1 }
  0xf4   : > { %v514_v10 = vmax.f32 %v436_v8, 0.0  ;;  %v1145_v11 = vpop.f32.mrb[2].mxu0 }
  0xf5   : > { %v451_v14 = vadd.f32 %v1145_v11, %v1655_v4  ;;  %v445_v15 = vpop.f32.mrb[3].mxu0 }
  0xf6   : > { %v446_v16 = vadd.f32 %v1655_v4, %v445_v15  ;;  %1228 = vmatprep.mubr.f32.mxu0 %v514_v10  ;;  %v1671_v25 = vpop.f32.mrb[4].mxu1 }
  0xf7   : > { %1229 = vmatmul.mubr.f32.vlgmr.msra.gmra.mrb[16].mxu0 %v515_v13  ;;  %v517_v21 = vmax.f32 %v451_v14, 0.0  ;;  %v1673_v28 = vpop.f32.mrb[5].mxu1 }
  0xf8   : > { %v516_v18 = vmax.f32 %v446_v16, 0.0  ;;  %v1148_v19 = vpop.f32.mrb[4].mxu0 }
  0xf9   : > { %v461_v22 = vadd.f32 %v1148_v19, %v1655_v4  ;;  %v455_v23 = vpop.f32.mrb[5].mxu0 }
  0xfa   : > { %v456_v24 = vadd.f32 %v1655_v4, %v455_v23  ;;  %1231 = vmatprep.mubr.f32.mxu0 %v516_v18  ;;  %v1677_v33 = vpop.f32.mrb[6].mxu1 }
  0xfb   : > { %1232 = vmatmul.mubr.f32.gmra.mrb[18].mxu0 %v517_v21  ;;  %v519_v29 = vmax.f32 %v461_v22, 0.0  ;;  %v1679_v36 = vpop.f32.mrb[7].mxu1 }
  0xfc   : > { %v518_v26 = vmax.f32 %v456_v24, 0.0  ;;  %v1151_v27 = vpop.f32.mrb[6].mxu0 }
  0xfd   : > { %v471_v30 = vadd.f32 %v1151_v27, %v1655_v4  ;;  %v465_v31 = vpop.f32.mrb[7].mxu0 }
  0xfe   : > { %v466_v32 = vadd.f32 %v1655_v4, %v465_v31  ;;  %1234 = vmatprep.mubr.f32.mxu0 %v518_v26 }
  0xff   : > { %1235 = vmatmul.mubr.f32.gmra.mrb[20].mxu0 %v519_v29  ;;  %v521_v37 = vmax.f32 %v471_v30, 0.0 }
 0x100   : > { %v520_v34 = vmax.f32 %v466_v32, 0.0  ;;  %v1154_v35 = vpop.f32.mrb[8].mxu0 }
 0x101   : > { %v481_v38 = vadd.f32 %v1154_v35, %v1655_v4  ;;  %v475_v39 = vpop.f32.mrb[9].mxu0 }
 0x102   : > { %v476_v40 = vadd.f32 %v1655_v4, %v475_v39  ;;  %1237 = vmatprep.mubr.f32.mxu0 %v520_v34 }
 0x103   : > { %1238 = vmatmul.mubr.f32.gmra.mrb[22].mxu0 %v521_v37  ;;  %v523_v43 = vmax.f32 %v481_v38, 0.0 }
 0x104   : > { %v522_v41 = vmax.f32 %v476_v40, 0.0  ;;  %v1157_v42 = vpop.f32.mrb[10].mxu0 }
 0x105   : > { %v491_v44 = vadd.f32 %v1157_v42, %v1655_v4  ;;  %v485_v45 = vpop.f32.mrb[11].mxu0 }
 0x106   : > { %v486_v46 = vadd.f32 %v1655_v4, %v485_v45  ;;  %1240 = vmatprep.mubr.f32.mxu1 %v522_v41 }
 0x107   : > { %1241 = vmatmul.mubr.f32.vlgmr.msra.gmra.mrb[8].mxu1 %v523_v43  ;;  %v525_v49 = vmax.f32 %v491_v44, 0.0 }
 0x108   : > { %v524_v47 = vmax.f32 %v486_v46, 0.0  ;;  %v1160_v48 = vpop.f32.mrb[12].mxu0 }
 0x109   : > { %v501_v50 = vadd.f32 %v1160_v48, %v1655_v4  ;;  %v495_v51 = vpop.f32.mrb[13].mxu0 }
 0x10a   : > { %v496_v52 = vadd.f32 %v1655_v4, %v495_v51  ;;  %1243 = vmatprep.mubr.f32.mxu1 %v524_v47 }
 0x10b   : > { %1244 = vmatmul.mubr.f32.gmra.mrb[10].mxu1 %v525_v49  ;;  %v527_v55 = vmax.f32 %v501_v50, 0.0 }
 0x10c   : > { %v526_v53 = vmax.f32 %v496_v52, 0.0  ;;  %v1163_v54 = vpop.f32.mrb[14].mxu0 }
 0x10d   : > { %v511_v56 = vadd.f32 %v1163_v54, %v1655_v4  ;;  %v505_v57 = vpop.f32.mrb[15].mxu0 }
 0x10e   : > { %v506_v58 = vadd.f32 %v1655_v4, %v505_v57  ;;  %1246 = vmatprep.mubr.f32.mxu1 %v526_v53 }
 0x10f   : > { %1247 = vmatmul.mubr.f32.gmra.mrb[12].mxu1 %v527_v55  ;;  %v529_v60 = vmax.f32 %v511_v56, 0.0 }
 0x110   : > { %v528_v59 = vmax.f32 %v506_v58, 0.0 }
 0x112   : > { %1249 = vmatprep.mubr.f32.mxu1 %v528_v59 }
 0x113   : > { %1250 = vmatmul.mubr.f32.gmra.mrb[14].mxu1 %v529_v60 }
 0x1ca   : > { %v1230_v61 = vpop.f32.mrb[16].mxu0 }
 0x1cb   : > { %v815_v63 = vadd.f32 %v1230_v61, %v1659_v9  ;;  %v809_v0 = vpop.f32.mrb[17].mxu0 }
 0x1cc   : > { %v810_v1 = vadd.f32 %v809_v0, %v1661_v12 }
 0x1cd   : > { %v896_v2 = vadd.f32 %v1049_v62, %v815_v63 }
 0x1ce   : > { %v895_v3 = vadd.f32 %v1049_v62, %v810_v1  ;;  %v1233_v4 = vpop.f32.mrb[18].mxu0 }
 0x1cf   : > { %912 = vst [vmem:[%s1697_s13 + $0x8] sm:$0xff] %v896_v2  ;;  %v825_v5 = vadd.f32 %v1233_v4, %v1665_v17  ;;  %v819_v6 = vpop.f32.mrb[19].mxu0 }
 0x1d0   : > { %911 = vst [vmem:[%s1697_s13] sm:$0xff] %v895_v3  ;;  %v820_v7 = vadd.f32 %v819_v6, %v1667_v20 }
 0x1d1   : > { %v898_v8 = vadd.f32 %v1049_v62, %v825_v5 }
 0x1d2   : > { %v897_v9 = vadd.f32 %v1049_v62, %v820_v7  ;;  %v1236_v10 = vpop.f32.mrb[20].mxu0 }
 0x1d3   : > { %914 = vst [vmem:[%s1697_s13 + $0x18] sm:$0xff] %v898_v8  ;;  %v835_v11 = vadd.f32 %v1236_v10, %v1671_v25  ;;  %v829_v12 = vpop.f32.mrb[21].mxu0 }
 0x1d4   : > { %913 = vst [vmem:[%s1697_s13 + $0x10] sm:$0xff] %v897_v9  ;;  %v830_v13 = vadd.f32 %v829_v12, %v1673_v28 }
 0x1d5   : > { %v900_v14 = vadd.f32 %v1049_v62, %v835_v11 }
 0x1d6   : > { %v899_v15 = vadd.f32 %v1049_v62, %v830_v13  ;;  %v1239_v16 = vpop.f32.mrb[22].mxu0 }
 0x1d7   : > { %916 = vst [vmem:[%s1697_s13 + $0x28] sm:$0xff] %v900_v14  ;;  %v845_v17 = vadd.f32 %v1239_v16, %v1677_v33  ;;  %v839_v18 = vpop.f32.mrb[23].mxu0 }
 0x1d8   : > { %915 = vst [vmem:[%s1697_s13 + $0x20] sm:$0xff] %v899_v15  ;;  %v840_v19 = vadd.f32 %v839_v18, %v1679_v36 }
 0x1d9   : > { %v902_v20 = vadd.f32 %v1049_v62, %v845_v17 }
 0x1da   : > { %v901_v21 = vadd.f32 %v1049_v62, %v840_v19  ;;  %v1242_v22 = vpop.f32.mrb[8].mxu1 }
 0x1db   : > { %918 = vst [vmem:[%s1697_s13 + $0x38] sm:$0xff] %v902_v20  ;;  %v904_v23 = vadd.f32 %v1242_v22, %v1049_v62  ;;  %v849_v24 = vpop.f32.mrb[9].mxu1 }
 0x1dc   : > { %917 = vst [vmem:[%s1697_s13 + $0x30] sm:$0xff] %v901_v21  ;;  %v903_v25 = vadd.f32 %v1049_v62, %v849_v24 }
 0x1dd   : > { %920 = vst [vmem:[%s1697_s13 + $0x48] sm:$0xff] %v904_v23 }
 0x1de   : > { %919 = vst [vmem:[%s1697_s13 + $0x40] sm:$0xff] %v903_v25  ;;  %v1245_v26 = vpop.f32.mrb[10].mxu1 }
 0x1df   : > { %v906_v27 = vadd.f32 %v1245_v26, %v1049_v62  ;;  %v859_v28 = vpop.f32.mrb[11].mxu1 }
 0x1e0   : > { %v905_v29 = vadd.f32 %v1049_v62, %v859_v28 }
 0x1e1   : > { %922 = vst [vmem:[%s1697_s13 + $0x58] sm:$0xff] %v906_v27 }
 0x1e2   : > { %921 = vst [vmem:[%s1697_s13 + $0x50] sm:$0xff] %v905_v29  ;;  %v1248_v30 = vpop.f32.mrb[12].mxu1 }
 0x1e3   : > { %v908_v31 = vadd.f32 %v1248_v30, %v1049_v62  ;;  %v869_v32 = vpop.f32.mrb[13].mxu1 }
 0x1e4   : > { %v907_v33 = vadd.f32 %v1049_v62, %v869_v32  ;;  %934 = sbr.rel (!%p1512_p5) target bundleno = 519 (0x207), region = 48 }
 0x1e5   : > { %924 = vst [vmem:[%s1697_s13 + $0x68] sm:$0xff] %v908_v31 }
 0x1e6   : > { %923 = vst [vmem:[%s1697_s13 + $0x60] sm:$0xff] %v907_v33  ;;  %v1251_v34 = vpop.f32.mrb[14].mxu1 }
 0x1e7   : > { %v910_v35 = vadd.f32 %v1251_v34, %v1049_v62  ;;  %v879_v36 = vpop.f32.mrb[15].mxu1 }
 0x1e8   : > { %v909_v37 = vadd.f32 %v1049_v62, %v879_v36 }
 0x1e9   : > { %926 = vst [vmem:[%s1697_s13 + $0x78] sm:$0xff] %v910_v35 }
 0x1ea   : > { %925 = vst [vmem:[%s1697_s13 + $0x70] sm:$0xff] %v909_v37 }
 0x1eb   : > { %s1798_s16 = smov (!%p937_p11, %s936_s16), 16 }
 0x1ec   : > { %s1728_s17 = sshll.u32 %s1798_s16, 7 }
 0x1ed   : > { %s941_s20 = ssub.s32 2048, %s1728_s17 }
 0x1ee   : > { %942 = vsyncadd %s1723_s14, %s941_s20  ;;  %p1053_p12 = scmp.ne.s32.totalorder %s1728_s17, 0  ;;  %s1059_s18 = sshll.u32 %s1495_s25, 11 }
 0x1ef   : > { %s1737_s26 = scalar_lea.hbm %s1790_s6, %s1059_s18  ;;  %s947_s15 = sshll.u32 %s1697_s13, 4  ;;  %s1740_s15 = int_to_ptr.vmem [resolvable:$true] %s947_s15 }
 0x1f0   : > { %s1372_s28 = scalar_lea.vmem %s1740_s15, %s1728_s17  ;;  %s1436_s29 = smov [#allocation2]  }
 0x1f1   : > { %p1373_p13 = scmp.ne.s32.totalorder %s1740_s15, %s1372_s28  ;;  %s1376_s10 = sshll.u32 %s1436_s29, 4  ;;  %s1377_s10 = int_to_ptr.vmem [resolvable:$false] %s1376_s10 }
 0x1f2   : > { %s1378_s25 = scalar_lea.vmem %s1377_s10, 4096  ;;  %p1379_p2 = scmp.lt.s32.totalorder %s1740_s15, %s1377_s10 }
 0x1f3   : > { %p1374_p0 = pnand %p1373_p13, %p1053_p12  ;;  %p1380_p3 = scmp.lt.s32.totalorder %s1378_s25, %s1372_s28 }
 0x1f5   : > { %p1375_p1 = pneg %p1374_p0  ;;  %p1381_p4 = por %p1380_p3, %p1379_p2 }
 0x1f7   : > { %p1382_p5 = pnand %p1381_p4, %p1375_p1 }
 0x1f9   : > { %1385 = shalt.err (!%p1382_p5)
}
 0x1fa   : > { %s1386_s9 = scalar_lea.hbm %s1737_s26, %s1728_s17  ;;  %s1390_s13 = scalar_lea.hbm %s1790_s6, 4864 }
 0x1fb   : > { %p1387_p7 = scmp.ne.s32.totalorder %s1737_s26, %s1386_s9  ;;  %p1391_p10 = scmp.lt.u32.totalorder %s1737_s26, %s1790_s6 }
 0x1fc   : > { %p1392_p11 = scmp.lt.u32.totalorder %s1390_s13, %s1386_s9  ;;  %p1394_p0 = scmp.lt.u32.totalorder %s1386_s9, %s1737_s26 }
 0x1fd   : > { %p1388_p8 = pnand %p1387_p7, %p1053_p12 }
 0x1fe   : > { %p1393_p13 = por %p1392_p11, %p1391_p10 }
 0x1ff   : > { %p1389_p9 = pneg %p1388_p8 }
 0x200   : > { %p1395_p1 = por %p1394_p0, %p1393_p13 }
 0x202   : > { %p1396_p2 = pnand %p1395_p1, %p1389_p9 }
 0x204   : > { %1399 = shalt.err (!%p1396_p2)
}
 0x205   : > { %s1437_s18 = smov 128   ;;  %s1438_s19 = smov 8  }
 0x206   : > { %953 = dma.vmem_to_hbm [thread:$0]  (%p1053_p12), %s1740_s15, %s1728_s17, %s1737_s26, %s1723_s14, %s1437_s18, %s1437_s18, %s1438_s19  }
 0x207 PF: > { %p1337_p3 = scmp.ge.s32.totalorder %s1434_s24, 2  ;;  %s962_s7 = sand.u32 1, %s1422_s21  }
 0x208   : > { %s963_s28 = scalar_lea.sflag [#allocation3], %s962_s7 }
 0x209   : > { %p1334_p4 = pnand %p1337_p3, %p1516_p6 }
 0x20b   : > { %1417 = dma.done.wait (!%p1334_p4), %s963_s28, 2048  }
 0x20c   : > { %1419 = vsyncadd (!%p1334_p4), %s963_s28, 4294965248  ;;  %p16_p5 = scmp.ge.s32.totalorder %s1499_s27, 5   ;;  %s1793_s21 = smov %s1426_s22 }
 0x20d   : > { %s1794_s22 = smov %s1430_s23  ;;  %s1795_s23 = smov %s1510_s30 }
 0x20e   : > { %s1796_s24 = smov %s1499_s27  ;;  %18 = sbr.rel (!%p16_p5) target bundleno = 3 (0x3), region = 79 }
 0x215   :  { %968 = vsyncpa [#allocation3], 1 }
 0x216   :  { %970 = vsyncpa [#allocation3 + $0x1], 1 }

// kernel: tpu_custom_call.1
= control target key start
LH: loop header
LB: loop body
LE: loop exit
PB: predicated region body
PF: predicated region fallthrough
CT: control target
= control target key end

     0   :  { %11 = vsyncpa [#allocation3], 0  ;;  %s1784_s0 = inlined_call_operand.vmem [shape: f32[300,32], index: 0, kind: input, shape index: {}]   ;;  %s1785_s1 = inlined_call_operand.vmem [shape: f32[32,128], index: 1, kind: input, shape index: {}]   ;;  %s1786_s2 = inlined_call_operand.vmem [shape: f32[1,128], index: 2, kind: input, shape index: {}]   ;;  %s1787_s3 = inlined_call_operand.vmem [shape: f32[128,128], index: 3, kind: input, shape index: {}]   ;;  %s1788_s4 = inlined_call_operand.vmem [shape: f32[32,128], index: 4, kind: input, shape index: {}]   ;;  %s1789_s5 = inlined_call_operand.vmem [shape: f32[1,128], index: 5, kind: input, shape index: {}]   ;;  %s1790_s6 = inlined_call_operand.hbm [shape: f32[300,128], index: 6, kind: output, shape index: {}]  }
   0x1   :  { %13 = vsyncpa [#allocation3 + $0x1], 0  ;;  %s1474_s21 = smov 0   ;;  %s1476_s22 = smov 0  }
   0x2   :  { %s1478_s23 = smov 0   ;;  %s1480_s24 = smov 0  }
   0x3 LB: > { %s1495_s25 = sadd.s32 4294967295, %s1434_s24   ;;  %s1009_s26 = sadd.s32 4294967294, %s1434_s24   ;;  %s1434_s24 = sphi %s1480_s24, %s1796_s24   ;;  %s1430_s23 = sphi %s1478_s23, %s1795_s23   ;;  %s1426_s22 = sphi %s1476_s22, %s1794_s22   ;;  %s1422_s21 = sphi %s1474_s21, %s1793_s21  }
   0x4   : > { %s1499_s27 = sadd.s32 1, %s1434_s24   ;;  %s157_s28 = sadd.s32 1, %s1430_s23 }
   0x5   : > { %s154_s29 = ssub.s32 %s1434_s24, %s1499_s27  ;;  %p167_p0 = scmp.ne.s32.totalorder %s1430_s23, %s1426_s22 }
   0x6   : > { %p155_p1 = scmp.eq.s32.totalorder %s154_s29, 0  ;;  %p168_p2 = scmp.eq.s32.totalorder %s1495_s25, 2 }
   0x7   : > { %p173_p3 = scmp.ne.s32.totalorder %s1426_s22, %s1422_s21  ;;  %p174_p4 = scmp.eq.s32.totalorder %s1009_s26, 2 }
   0x8   : > { %s1510_s30 = scalar_select %p155_p1, %s1430_s23, %s157_s28  }
   0x9   : > { %p1512_p5 = por %p168_p2, %p167_p0  ;;  %p1516_p6 = por %p174_p4, %p173_p3 }
   0xa   : > { %p1012_p7 = scmp.ge.s32.totalorder %s1434_s24, 1  ;;  %p224_p8 = scmp.lt.s32.totalorder %s1434_s24, 4 }
   0xc   : > { %p225_p9 = pnand %p1012_p7, %p224_p8 }
   0xd   : > { %v309_v0 = vld [vmem:[%s1785_s1] sm:$0xff] (!%p225_p9)  ;;  %v310_v1 = vld [vmem:[%s1785_s1 + $0x8] sm:$0xff] (!%p225_p9)  ;;  %v311_v2 = vld [vmem:[%s1785_s1 + $0x10] sm:$0xff] (!%p225_p9)  ;;  %s1532_s15 = sshll.u32 (!%p225_p9), %s1495_s25, 4  ;;  %vm320_vm0 = vcmask (!%p225_p9), 261120   ;;  %s255_s10 = sand.u32 (!%p225_p9), 1, %s1426_s22  }
   0xe   : > { %228 = sbr.rel (%p225_p9) target bundleno = 519 (0x207), region = 44  ;;  %v1252_v3 = vpack.c.bf16 (!%p225_p9), %v310_v1, %v309_v0  ;;  %v312_v4 = vld [vmem:[%s1785_s1 + $0x18] sm:$0xff] (!%p225_p9)  ;;  %p263_p10 = scmp.lt.s32.totalorder (!%p225_p9), %s1532_s15, 37  ;;  %v530_v6 = vld [vmem:[%s1787_s3] sm:$0xff] (!%p225_p9)  ;;  %v531_v7 = vld [vmem:[%s1787_s3 + $0x8] sm:$0xff] (!%p225_p9) }
   0xf   : > { %v1256_v5 = vpack.c.bf16 (!%p225_p9), %v312_v4, %v311_v2  ;;  %v546_v8 = vld [vmem:[%s1788_s4] sm:$0xff] (!%p225_p9)  ;;  %v547_v9 = vld [vmem:[%s1788_s4 + $0x8] sm:$0xff] (!%p225_p9)  ;;  %v548_v11 = vld [vmem:[%s1788_s4 + $0x10] sm:$0xff] (!%p225_p9)  ;;  %v1268_v13 = vpack.c.bf16 (!%p225_p9), %v531_v7, %v530_v6  ;;  %s1723_s14 = scalar_lea.sflag (!%p225_p9), [#allocation3], %s255_s10 }
  0x10   : > { %1253 = vmatprep.subr.bf16.mxu0 (!%p225_p9), %v1252_v3  ;;  %v1260_v10 = vpack.c.bf16 (!%p225_p9), %v547_v9, %v546_v8  ;;  %v549_v12 = vld [vmem:[%s1788_s4 + $0x18] sm:$0xff] (!%p225_p9)  ;;  %v532_v15 = vld [vmem:[%s1787_s3 + $0x10] sm:$0xff] (!%p225_p9)  ;;  %v534_v26 = vld [vmem:[%s1787_s3 + $0x20] sm:$0xff] (!%p225_p9) }
  0x11   : > { %1255 = vmatpush3.bf16.msra.mxu0 (!%p225_p9), %v1252_v3  ;;  %v1264_v14 = vpack.c.bf16 (!%p225_p9), %v549_v12, %v548_v11  ;;  %v533_v16 = vld [vmem:[%s1787_s3 + $0x18] sm:$0xff] (!%p225_p9)  ;;  %v535_v27 = vld [vmem:[%s1787_s3 + $0x28] sm:$0xff] (!%p225_p9)  ;;  %v536_v33 = vld [vmem:[%s1787_s3 + $0x30] sm:$0xff] (!%p225_p9) }
  0x12   : > { %1257 = vmatprep.subr.bf16.mxu0 (!%p225_p9), %v1256_v5  ;;  %1261 = vmatprep.subr.bf16.mxu1 (!%p225_p9), %v1260_v10  ;;  %v1272_v25 = vpack.c.bf16 (!%p225_p9), %v533_v16, %v532_v15  ;;  %v1276_v32 = vpack.c.bf16 (!%p225_p9), %v535_v27, %v534_v26  ;;  %v537_v34 = vld [vmem:[%s1787_s3 + $0x38] sm:$0xff] (!%p225_p9)  ;;  %v538_v40 = vld [vmem:[%s1787_s3 + $0x40] sm:$0xff] (!%p225_p9)  ;;  %v539_v41 = vld [vmem:[%s1787_s3 + $0x48] sm:$0xff] (!%p225_p9) }
  0x13   : > { %1263 = vmatpush3.bf16.msra.mxu1 (!%p225_p9), %v1260_v10  ;;  %v1280_v39 = vpack.c.bf16 (!%p225_p9), %v537_v34, %v536_v33  ;;  %v1284_v46 = vpack.c.bf16 (!%p225_p9), %v539_v41, %v538_v40  ;;  %v540_v47 = vld [vmem:[%s1787_s3 + $0x50] sm:$0xff] (!%p225_p9)  ;;  %v541_v48 = vld [vmem:[%s1787_s3 + $0x58] sm:$0xff] (!%p225_p9)  ;;  %v542_v54 = vld [vmem:[%s1787_s3 + $0x60] sm:$0xff] (!%p225_p9) }
  0x14   : > { %1265 = vmatprep.subr.bf16.mxu1 (!%p225_p9), %v1264_v14  ;;  %v1288_v53 = vpack.c.bf16 (!%p225_p9), %v541_v48, %v540_v47  ;;  %v543_v55 = vld [vmem:[%s1787_s3 + $0x68] sm:$0xff] (!%p225_p9)  ;;  %v544_v1 = vld [vmem:[%s1787_s3 + $0x70] sm:$0xff] (!%p225_p9)  ;;  %v545_v2 = vld [vmem:[%s1787_s3 + $0x78] sm:$0xff] (!%p225_p9) }
  0x15   : > { %s264_s9 = scalar_select %p263_p10, %s1532_s15, 37  ;;  %1259 = vmatpush3.bf16.msra.mxu0 %v1256_v5  ;;  %v1292_v60 = vpack.c.bf16 %v543_v55, %v542_v54  ;;  %v1296_v3 = vpack.c.bf16 %v545_v2, %v544_v1  ;;  %v1655_v4 = vld [vmem:[%s1786_s2] ss:$0 sm:$0xff] }
  0x16   : > { %1269 = vmatprep.subr.bf16.mxu0 %v1268_v13  ;;  %s936_s16 = ssub.s32 (%p1512_p5), 38, %s1532_s15 }
  0x17   : > { %s1015_s17 = sshll.u32 %s264_s9, 3  ;;  %1267 = vmatpush3.bf16.msra.mxu1 %v1264_v14  ;;  %s1013_s9 = sshll.u32 %s255_s10, 7 }
  0x18   : > { %s1560_s20 = scalar_lea.vmem %s1784_s0, %s1015_s17  ;;  %1300 = vmatprep.subr.bf16.mxu1 %v1268_v13  ;;  %s1697_s13 = scalar_lea.vmem [#allocation2], %s1013_s9 }
  0x19   : > { %v277_v17 = vld [vmem:[%s1560_s20] sm:$0xff]  ;;  %v278_v18 = vld [vmem:[%s1560_s20 + $0x8] sm:$0xff]  ;;  %v279_v19 = vld [vmem:[%s1560_s20 + $0x10] sm:$0xff]  ;;  %p937_p11 = scmp.lt.s32.totalorder (%p1512_p5), %s936_s16, 16 }
  0x1a   : > { %v293_v20 = vmax.f32 %v277_v17, 0.0  ;;  %v294_v21 = vmax.f32 %v278_v18, 0.0  ;;  %v295_v22 = vmax.f32 %v279_v19, 0.0  ;;  %v280_v23 = vld [vmem:[%s1560_s20 + $0x18] sm:$0xff]  ;;  %v281_v24 = vld [vmem:[%s1560_s20 + $0x20] sm:$0xff]  ;;  %1172 = vmatprep.mubr.msk.f32.mxu1 %vm320_vm0, %v277_v17  ;;  %v282_v30 = vld [vmem:[%s1560_s20 + $0x28] sm:$0xff] }
  0x1b   : > { %v296_v28 = vmax.f32 %v280_v23, 0.0  ;;  %v297_v29 = vmax.f32 %v281_v24, 0.0  ;;  %v283_v31 = vld [vmem:[%s1560_s20 + $0x30] sm:$0xff]  ;;  %1173 = vmatmul.mubr.msk.f32.vlgmr.msra.gmra.mrb[0].mxu1 %vm320_vm0, %v278_v18  ;;  %v298_v35 = vmax.f32 %v282_v30, 0.0  ;;  %v284_v37 = vld [vmem:[%s1560_s20 + $0x38] sm:$0xff]  ;;  %v285_v38 = vld [vmem:[%s1560_s20 + $0x40] sm:$0xff] }
  0x1c   : > { %1140 = vmatprep.mubr.msk.f32.mxu0 %vm320_vm0, %v293_v20  ;;  %1308 = vmatpush3.bf16.msra.mxu1 %v1268_v13  ;;  %v299_v36 = vmax.f32 %v283_v31, 0.0  ;;  %v300_v42 = vmax.f32 %v284_v37, 0.0  ;;  %v301_v43 = vmax.f32 %v285_v38, 0.0  ;;  %v286_v44 = vld [vmem:[%s1560_s20 + $0x48] sm:$0xff]  ;;  %v287_v45 = vld [vmem:[%s1560_s20 + $0x50] sm:$0xff]  ;;  %v288_v51 = vld [vmem:[%s1560_s20 + $0x58] sm:$0xff] }
  0x1d   : > { %1141 = vmatmul.mubr.msk.f32.vlgmr.msra.gmra.mrb[0].mxu0 %vm320_vm0, %v294_v21  ;;  %1175 = vmatprep.mubr.msk.f32.mxu1 %vm320_vm0, %v279_v19  ;;  %v302_v49 = vmax.f32 %v286_v44, 0.0  ;;  %v303_v50 = vmax.f32 %v287_v45, 0.0  ;;  %v289_v52 = vld [vmem:[%s1560_s20 + $0x60] sm:$0xff]  ;;  %v304_v56 = vmax.f32 %v288_v51, 0.0  ;;  %v290_v58 = vld [vmem:[%s1560_s20 + $0x68] sm:$0xff]  ;;  %v291_v59 = vld [vmem:[%s1560_s20 + $0x70] sm:$0xff] }
  0x1e   : > { %1143 = vmatprep.mubr.msk.f32.mxu0 %vm320_vm0, %v295_v22  ;;  %1271 = vmatpush3.bf16.msra.mxu0 %v1268_v13  ;;  %v305_v57 = vmax.f32 %v289_v52, 0.0  ;;  %v306_v61 = vmax.f32 %v290_v58, 0.0  ;;  %v307_v62 = vmax.f32 %v291_v59, 0.0  ;;  %v292_v63 = vld [vmem:[%s1560_s20 + $0x78] sm:$0xff] }
  0x1f   : > { %1273 = vmatprep.subr.bf16.mxu0 %v1272_v25  ;;  %1176 = vmatmul.mubr.msk.f32.gmra.mrb[2].mxu1 %vm320_vm0, %v280_v23  ;;  %v308_v0 = vmax.f32 %v292_v63, 0.0 }
  0x20   : > { %1301 = vmatprep.subr.bf16.mxu1 %v1272_v25  ;;  %1178 = vmatprep.mubr.msk.f32.mxu1 %vm320_vm0, %v281_v24 }
  0x21   : > { %1144 = vmatmul.mubr.msk.f32.gmra.mrb[2].mxu0 %vm320_vm0, %v296_v28  ;;  %1309 = vmatpush3.bf16.msra.mxu1 %v1272_v25 }
  0x22   : > { %1146 = vmatprep.mubr.msk.f32.mxu0 %vm320_vm0, %v297_v29  ;;  %1275 = vmatpush3.bf16.msra.mxu0 %v1272_v25 }
  0x23   : > { %1277 = vmatprep.subr.bf16.mxu0 %v1276_v32  ;;  %1179 = vmatmul.mubr.msk.f32.gmra.mrb[4].mxu1 %vm320_vm0, %v282_v30 }
  0x24   : > { %1302 = vmatprep.subr.bf16.mxu1 %v1276_v32  ;;  %1181 = vmatprep.mubr.msk.f32.mxu1 %vm320_vm0, %v283_v31 }
  0x25   : > { %1147 = vmatmul.mubr.msk.f32.gmra.mrb[4].mxu0 %vm320_vm0, %v298_v35  ;;  %1310 = vmatpush3.bf16.msra.mxu1 %v1276_v32 }
  0x26   : > { %1149 = vmatprep.mubr.msk.f32.mxu0 %vm320_vm0, %v299_v36  ;;  %1279 = vmatpush3.bf16.msra.mxu0 %v1276_v32 }
  0x27   : > { %1281 = vmatprep.subr.bf16.mxu0 %v1280_v39  ;;  %1182 = vmatmul.mubr.msk.f32.gmra.mrb[6].mxu1 %vm320_vm0, %v284_v37 }
  0x28   : > { %1303 = vmatprep.subr.bf16.mxu1 %v1280_v39  ;;  %1184 = vmatprep.mubr.msk.f32.mxu1 %vm320_vm0, %v285_v38 }
  0x29   : > { %1150 = vmatmul.mubr.msk.f32.gmra.mrb[6].mxu0 %vm320_vm0, %v300_v42  ;;  %1311 = vmatpush3.bf16.msra.mxu1 %v1280_v39 }
  0x2a   : > { %1152 = vmatprep.mubr.msk.f32.mxu0 %vm320_vm0, %v301_v43  ;;  %1283 = vmatpush3.bf16.msra.mxu0 %v1280_v39 }
  0x2b   : > { %1285 = vmatprep.subr.bf16.mxu0 %v1284_v46  ;;  %1304 = vmatprep.subr.bf16.mxu1 %v1284_v46 }
  0x2c   : > { %1185 = vmatmul.mubr.msk.f32.gmra.mrb[8].mxu1 %vm320_vm0, %v286_v44 }
  0x2d   : > { %1153 = vmatmul.mubr.msk.f32.gmra.mrb[8].mxu0 %vm320_vm0, %v302_v49  ;;  %1312 = vmatpush3.bf16.msra.mxu1 %v1284_v46 }
  0x2e   : > { %1155 = vmatprep.mubr.msk.f32.mxu0 %vm320_vm0, %v303_v50  ;;  %1287 = vmatpush3.bf16.msra.mxu0 %v1284_v46 }
  0x2f   : > { %1289 = vmatprep.subr.bf16.mxu0 %v1288_v53  ;;  %1187 = vmatprep.mubr.msk.f32.mxu1 %vm320_vm0, %v287_v45 }
  0x30   : > { %1305 = vmatprep.subr.bf16.mxu1 %v1288_v53  ;;  %1188 = vmatmul.mubr.msk.f32.gmra.mrb[10].mxu1 %vm320_vm0, %v288_v51 }
  0x31   : > { %1156 = vmatmul.mubr.msk.f32.gmra.mrb[10].mxu0 %vm320_vm0, %v304_v56  ;;  %1313 = vmatpush3.bf16.msra.mxu1 %v1288_v53 }
  0x32   : > { %1158 = vmatprep.mubr.msk.f32.mxu0 %vm320_vm0, %v305_v57  ;;  %1291 = vmatpush3.bf16.msra.mxu0 %v1288_v53 }
  0x33   : > { %1293 = vmatprep.subr.bf16.mxu0 %v1292_v60  ;;  %1190 = vmatprep.mubr.msk.f32.mxu1 %vm320_vm0, %v289_v52 }
  0x34   : > { %1306 = vmatprep.subr.bf16.mxu1 %v1292_v60  ;;  %1191 = vmatmul.mubr.msk.f32.gmra.mrb[12].mxu1 %vm320_vm0, %v290_v58 }
  0x35   : > { %1159 = vmatmul.mubr.msk.f32.gmra.mrb[12].mxu0 %vm320_vm0, %v306_v61  ;;  %1314 = vmatpush3.bf16.msra.mxu1 %v1292_v60 }
  0x36   : > { %1161 = vmatprep.mubr.msk.f32.mxu0 %vm320_vm0, %v307_v62  ;;  %1295 = vmatpush3.bf16.msra.mxu0 %v1292_v60  ;;  %v1049_v62 = vld [vmem:[%s1789_s5] ss:$0 sm:$0xff] }
  0x37   : > { %1193 = vmatprep.mubr.msk.f32.mxu1 %vm320_vm0, %v291_v59  ;;  %1297 = vmatprep.subr.bf16.mxu0 %v1296_v3 }
  0x38   : > { %1194 = vmatmul.mubr.msk.f32.gmra.mrb[14].mxu1 %vm320_vm0, %v292_v63  ;;  %1307 = vmatprep.subr.bf16.mxu1 %v1296_v3 }
  0x39   : > { %1162 = vmatmul.mubr.msk.f32.gmra.mrb[14].mxu0 %vm320_vm0, %v308_v0  ;;  %1315 = vmatpush3.bf16.msra.mxu1 %v1296_v3 }
  0x3a   : > { %1299 = vmatpush3.bf16.msra.mxu0 %v1296_v3 }
  0xee   : > { %v1659_v9 = vpop.f32.mrb[0].mxu1 }
  0xef   : > { %v1661_v12 = vpop.f32.mrb[1].mxu1 }
  0xf0   : > { %v1142_v5 = vpop.f32.mrb[0].mxu0 }
  0xf1   : > { %v441_v6 = vadd.f32 %v1142_v5, %v1655_v4  ;;  %v435_v7 = vpop.f32.mrb[1].mxu0 }
  0xf2   : > { %v436_v8 = vadd.f32 %v1655_v4, %v435_v7  ;;  %v1665_v17 = vpop.f32.mrb[2].mxu1 }
  0xf3   : > { %v515_v13 = vmax.f32 %v441_v6, 0.0  ;;  %v1667_v20 = vpop.f32.mrb[3].mxu1 }
  0xf4   : > { %v514_v10 = vmax.f32 %v436_v8, 0.0  ;;  %v1145_v11 = vpop.f32.mrb[2].mxu0 }
  0xf5   : > { %v451_v14 = vadd.f32 %v1145_v11, %v1655_v4  ;;  %v445_v15 = vpop.f32.mrb[3].mxu0 }
  0xf6   : > { %v446_v16 = vadd.f32 %v1655_v4, %v445_v15  ;;  %1228 = vmatprep.mubr.f32.mxu0 %v514_v10  ;;  %v1671_v25 = vpop.f32.mrb[4].mxu1 }
  0xf7   : > { %1229 = vmatmul.mubr.f32.vlgmr.msra.gmra.mrb[16].mxu0 %v515_v13  ;;  %v517_v21 = vmax.f32 %v451_v14, 0.0  ;;  %v1673_v28 = vpop.f32.mrb[5].mxu1 }
  0xf8   : > { %v516_v18 = vmax.f32 %v446_v16, 0.0  ;;  %v1148_v19 = vpop.f32.mrb[4].mxu0 }
  0xf9   : > { %v461_v22 = vadd.f32 %v1148_v19, %v1655_v4  ;;  %v455_v23 = vpop.f32.mrb[5].mxu0 }
  0xfa   : > { %v456_v24 = vadd.f32 %v1655_v4, %v455_v23  ;;  %1231 = vmatprep.mubr.f32.mxu0 %v516_v18  ;;  %v1677_v33 = vpop.f32.mrb[6].mxu1 }
  0xfb   : > { %1232 = vmatmul.mubr.f32.gmra.mrb[18].mxu0 %v517_v21  ;;  %v519_v29 = vmax.f32 %v461_v22, 0.0  ;;  %v1679_v36 = vpop.f32.mrb[7].mxu1 }
  0xfc   : > { %v518_v26 = vmax.f32 %v456_v24, 0.0  ;;  %v1151_v27 = vpop.f32.mrb[6].mxu0 }
  0xfd   : > { %v471_v30 = vadd.f32 %v1151_v27, %v1655_v4  ;;  %v465_v31 = vpop.f32.mrb[7].mxu0 }
  0xfe   : > { %v466_v32 = vadd.f32 %v1655_v4, %v465_v31  ;;  %1234 = vmatprep.mubr.f32.mxu0 %v518_v26 }
  0xff   : > { %1235 = vmatmul.mubr.f32.gmra.mrb[20].mxu0 %v519_v29  ;;  %v521_v37 = vmax.f32 %v471_v30, 0.0 }
 0x100   : > { %v520_v34 = vmax.f32 %v466_v32, 0.0  ;;  %v1154_v35 = vpop.f32.mrb[8].mxu0 }
 0x101   : > { %v481_v38 = vadd.f32 %v1154_v35, %v1655_v4  ;;  %v475_v39 = vpop.f32.mrb[9].mxu0 }
 0x102   : > { %v476_v40 = vadd.f32 %v1655_v4, %v475_v39  ;;  %1237 = vmatprep.mubr.f32.mxu0 %v520_v34 }
 0x103   : > { %1238 = vmatmul.mubr.f32.gmra.mrb[22].mxu0 %v521_v37  ;;  %v523_v43 = vmax.f32 %v481_v38, 0.0 }
 0x104   : > { %v522_v41 = vmax.f32 %v476_v40, 0.0  ;;  %v1157_v42 = vpop.f32.mrb[10].mxu0 }
 0x105   : > { %v491_v44 = vadd.f32 %v1157_v42, %v1655_v4  ;;  %v485_v45 = vpop.f32.mrb[11].mxu0 }
 0x106   : > { %v486_v46 = vadd.f32 %v1655_v4, %v485_v45  ;;  %1240 = vmatprep.mubr.f32.mxu1 %v522_v41 }
 0x107   : > { %1241 = vmatmul.mubr.f32.vlgmr.msra.gmra.mrb[8].mxu1 %v523_v43  ;;  %v525_v49 = vmax.f32 %v491_v44, 0.0 }
 0x108   : > { %v524_v47 = vmax.f32 %v486_v46, 0.0  ;;  %v1160_v48 = vpop.f32.mrb[12].mxu0 }
 0x109   : > { %v501_v50 = vadd.f32 %v1160_v48, %v1655_v4  ;;  %v495_v51 = vpop.f32.mrb[13].mxu0 }
 0x10a   : > { %v496_v52 = vadd.f32 %v1655_v4, %v495_v51  ;;  %1243 = vmatprep.mubr.f32.mxu1 %v524_v47 }
 0x10b   : > { %1244 = vmatmul.mubr.f32.gmra.mrb[10].mxu1 %v525_v49  ;;  %v527_v55 = vmax.f32 %v501_v50, 0.0 }
 0x10c   : > { %v526_v53 = vmax.f32 %v496_v52, 0.0  ;;  %v1163_v54 = vpop.f32.mrb[14].mxu0 }
 0x10d   : > { %v511_v56 = vadd.f32 %v1163_v54, %v1655_v4  ;;  %v505_v57 = vpop.f32.mrb[15].mxu0 }
 0x10e   : > { %v506_v58 = vadd.f32 %v1655_v4, %v505_v57  ;;  %1246 = vmatprep.mubr.f32.mxu1 %v526_v53 }
 0x10f   : > { %1247 = vmatmul.mubr.f32.gmra.mrb[12].mxu1 %v527_v55  ;;  %v529_v60 = vmax.f32 %v511_v56, 0.0 }
 0x110   : > { %v528_v59 = vmax.f32 %v506_v58, 0.0 }
 0x112   : > { %1249 = vmatprep.mubr.f32.mxu1 %v528_v59 }
 0x113   : > { %1250 = vmatmul.mubr.f32.gmra.mrb[14].mxu1 %v529_v60 }
 0x1ca   : > { %v1230_v61 = vpop.f32.mrb[16].mxu0 }
 0x1cb   : > { %v815_v63 = vadd.f32 %v1230_v61, %v1659_v9  ;;  %v809_v0 = vpop.f32.mrb[17].mxu0 }
 0x1cc   : > { %v810_v1 = vadd.f32 %v809_v0, %v1661_v12 }
 0x1cd   : > { %v896_v2 = vadd.f32 %v1049_v62, %v815_v63 }
 0x1ce   : > { %v895_v3 = vadd.f32 %v1049_v62, %v810_v1  ;;  %v1233_v4 = vpop.f32.mrb[18].mxu0 }
 0x1cf   : > { %912 = vst [vmem:[%s1697_s13 + $0x8] sm:$0xff] %v896_v2  ;;  %v825_v5 = vadd.f32 %v1233_v4, %v1665_v17  ;;  %v819_v6 = vpop.f32.mrb[19].mxu0 }
 0x1d0   : > { %911 = vst [vmem:[%s1697_s13] sm:$0xff] %v895_v3  ;;  %v820_v7 = vadd.f32 %v819_v6, %v1667_v20 }
 0x1d1   : > { %v898_v8 = vadd.f32 %v1049_v62, %v825_v5 }
 0x1d2   : > { %v897_v9 = vadd.f32 %v1049_v62, %v820_v7  ;;  %v1236_v10 = vpop.f32.mrb[20].mxu0 }
 0x1d3   : > { %914 = vst [vmem:[%s1697_s13 + $0x18] sm:$0xff] %v898_v8  ;;  %v835_v11 = vadd.f32 %v1236_v10, %v1671_v25  ;;  %v829_v12 = vpop.f32.mrb[21].mxu0 }
 0x1d4   : > { %913 = vst [vmem:[%s1697_s13 + $0x10] sm:$0xff] %v897_v9  ;;  %v830_v13 = vadd.f32 %v829_v12, %v1673_v28 }
 0x1d5   : > { %v900_v14 = vadd.f32 %v1049_v62, %v835_v11 }
 0x1d6   : > { %v899_v15 = vadd.f32 %v1049_v62, %v830_v13  ;;  %v1239_v16 = vpop.f32.mrb[22].mxu0 }
 0x1d7   : > { %916 = vst [vmem:[%s1697_s13 + $0x28] sm:$0xff] %v900_v14  ;;  %v845_v17 = vadd.f32 %v1239_v16, %v1677_v33  ;;  %v839_v18 = vpop.f32.mrb[23].mxu0 }
 0x1d8   : > { %915 = vst [vmem:[%s1697_s13 + $0x20] sm:$0xff] %v899_v15  ;;  %v840_v19 = vadd.f32 %v839_v18, %v1679_v36 }
 0x1d9   : > { %v902_v20 = vadd.f32 %v1049_v62, %v845_v17 }
 0x1da   : > { %v901_v21 = vadd.f32 %v1049_v62, %v840_v19  ;;  %v1242_v22 = vpop.f32.mrb[8].mxu1 }
 0x1db   : > { %918 = vst [vmem:[%s1697_s13 + $0x38] sm:$0xff] %v902_v20  ;;  %v904_v23 = vadd.f32 %v1242_v22, %v1049_v62  ;;  %v849_v24 = vpop.f32.mrb[9].mxu1 }
 0x1dc   : > { %917 = vst [vmem:[%s1697_s13 + $0x30] sm:$0xff] %v901_v21  ;;  %v903_v25 = vadd.f32 %v1049_v62, %v849_v24 }
 0x1dd   : > { %920 = vst [vmem:[%s1697_s13 + $0x48] sm:$0xff] %v904_v23 }
 0x1de   : > { %919 = vst [vmem:[%s1697_s13 + $0x40] sm:$0xff] %v903_v25  ;;  %v1245_v26 = vpop.f32.mrb[10].mxu1 }
 0x1df   : > { %v906_v27 = vadd.f32 %v1245_v26, %v1049_v62  ;;  %v859_v28 = vpop.f32.mrb[11].mxu1 }
 0x1e0   : > { %v905_v29 = vadd.f32 %v1049_v62, %v859_v28 }
 0x1e1   : > { %922 = vst [vmem:[%s1697_s13 + $0x58] sm:$0xff] %v906_v27 }
 0x1e2   : > { %921 = vst [vmem:[%s1697_s13 + $0x50] sm:$0xff] %v905_v29  ;;  %v1248_v30 = vpop.f32.mrb[12].mxu1 }
 0x1e3   : > { %v908_v31 = vadd.f32 %v1248_v30, %v1049_v62  ;;  %v869_v32 = vpop.f32.mrb[13].mxu1 }
 0x1e4   : > { %v907_v33 = vadd.f32 %v1049_v62, %v869_v32  ;;  %934 = sbr.rel (!%p1512_p5) target bundleno = 519 (0x207), region = 48 }
 0x1e5   : > { %924 = vst [vmem:[%s1697_s13 + $0x68] sm:$0xff] %v908_v31 }
 0x1e6   : > { %923 = vst [vmem:[%s1697_s13 + $0x60] sm:$0xff] %v907_v33  ;;  %v1251_v34 = vpop.f32.mrb[14].mxu1 }
 0x1e7   : > { %v910_v35 = vadd.f32 %v1251_v34, %v1049_v62  ;;  %v879_v36 = vpop.f32.mrb[15].mxu1 }
 0x1e8   : > { %v909_v37 = vadd.f32 %v1049_v62, %v879_v36 }
 0x1e9   : > { %926 = vst [vmem:[%s1697_s13 + $0x78] sm:$0xff] %v910_v35 }
 0x1ea   : > { %925 = vst [vmem:[%s1697_s13 + $0x70] sm:$0xff] %v909_v37 }
 0x1eb   : > { %s1798_s16 = smov (!%p937_p11, %s936_s16), 16 }
 0x1ec   : > { %s1728_s17 = sshll.u32 %s1798_s16, 7 }
 0x1ed   : > { %s941_s20 = ssub.s32 2048, %s1728_s17 }
 0x1ee   : > { %942 = vsyncadd %s1723_s14, %s941_s20  ;;  %p1053_p12 = scmp.ne.s32.totalorder %s1728_s17, 0  ;;  %s1059_s18 = sshll.u32 %s1495_s25, 11 }
 0x1ef   : > { %s1737_s26 = scalar_lea.hbm %s1790_s6, %s1059_s18  ;;  %s947_s15 = sshll.u32 %s1697_s13, 4  ;;  %s1740_s15 = int_to_ptr.vmem [resolvable:$true] %s947_s15 }
 0x1f0   : > { %s1372_s28 = scalar_lea.vmem %s1740_s15, %s1728_s17  ;;  %s1436_s29 = smov [#allocation2]  }
 0x1f1   : > { %p1373_p13 = scmp.ne.s32.totalorder %s1740_s15, %s1372_s28  ;;  %s1376_s10 = sshll.u32 %s1436_s29, 4  ;;  %s1377_s10 = int_to_ptr.vmem [resolvable:$false] %s1376_s10 }
 0x1f2   : > { %s1378_s25 = scalar_lea.vmem %s1377_s10, 4096  ;;  %p1379_p2 = scmp.lt.s32.totalorder %s1740_s15, %s1377_s10 }
 0x1f3   : > { %p1374_p0 = pnand %p1373_p13, %p1053_p12  ;;  %p1380_p3 = scmp.lt.s32.totalorder %s1378_s25, %s1372_s28 }
 0x1f5   : > { %p1375_p1 = pneg %p1374_p0  ;;  %p1381_p4 = por %p1380_p3, %p1379_p2 }
 0x1f7   : > { %p1382_p5 = pnand %p1381_p4, %p1375_p1 }
 0x1f9   : > { %1385 = shalt.err (!%p1382_p5)
}
 0x1fa   : > { %s1386_s9 = scalar_lea.hbm %s1737_s26, %s1728_s17  ;;  %s1390_s13 = scalar_lea.hbm %s1790_s6, 4864 }
 0x1fb   : > { %p1387_p7 = scmp.ne.s32.totalorder %s1737_s26, %s1386_s9  ;;  %p1391_p10 = scmp.lt.u32.totalorder %s1737_s26, %s1790_s6 }
 0x1fc   : > { %p1392_p11 = scmp.lt.u32.totalorder %s1390_s13, %s1386_s9  ;;  %p1394_p0 = scmp.lt.u32.totalorder %s1386_s9, %s1737_s26 }
 0x1fd   : > { %p1388_p8 = pnand %p1387_p7, %p1053_p12 }
 0x1fe   : > { %p1393_p13 = por %p1392_p11, %p1391_p10 }
 0x1ff   : > { %p1389_p9 = pneg %p1388_p8 }
 0x200   : > { %p1395_p1 = por %p1394_p0, %p1393_p13 }
 0x202   : > { %p1396_p2 = pnand %p1395_p1, %p1389_p9 }
 0x204   : > { %1399 = shalt.err (!%p1396_p2)
}
 0x205   : > { %s1437_s18 = smov 128   ;;  %s1438_s19 = smov 8  }
 0x206   : > { %953 = dma.vmem_to_hbm [thread:$0]  (%p1053_p12), %s1740_s15, %s1728_s17, %s1737_s26, %s1723_s14, %s1437_s18, %s1437_s18, %s1438_s19  }
 0x207 PF: > { %p1337_p3 = scmp.ge.s32.totalorder %s1434_s24, 2  ;;  %s962_s7 = sand.u32 1, %s1422_s21  }
 0x208   : > { %s963_s28 = scalar_lea.sflag [#allocation3], %s962_s7 }
 0x209   : > { %p1334_p4 = pnand %p1337_p3, %p1516_p6 }
 0x20b   : > { %1417 = dma.done.wait (!%p1334_p4), %s963_s28, 2048  }
 0x20c   : > { %1419 = vsyncadd (!%p1334_p4), %s963_s28, 4294965248  ;;  %p16_p5 = scmp.ge.s32.totalorder %s1499_s27, 5   ;;  %s1793_s21 = smov %s1426_s22 }
 0x20d   : > { %s1794_s22 = smov %s1430_s23  ;;  %s1795_s23 = smov %s1510_s30 }
 0x20e   : > { %s1796_s24 = smov %s1499_s27  ;;  %18 = sbr.rel (!%p16_p5) target bundleno = 3 (0x3), region = 79 }
 0x215   :  { %968 = vsyncpa [#allocation3], 1 }
 0x216   :  { %970 = vsyncpa [#allocation3 + $0x1], 1 }

</bundles_post_ra>
